<compile_context>
chip_gen: v7x
topology: tpu7x:2x2x1
jax: 0.10.0
libtpu: 0.0.40
codegen_flags: <defaults>
</compile_context>

<pallas_src>
import jax
import jax.numpy as jnp
from jax.experimental import pallas as pl
from jax.experimental.pallas import tpu as pltpu

_LANE = 128


def _copy_kernel(x_ref, o_ref):
    # Pure identity copy of the current VMEM tile (bulk vld + unmasked vst).
    o_ref[...] = x_ref[...]


def _chip_block_config():
    """Chip-aware (block_bytes, vmem_limit_bytes) for the memcpy tiling.

    Double-buffered in+out uses 4x block_bytes of VMEM; keep that (plus
    compiler scratch) comfortably inside the requested scoped-VMEM limit,
    which itself must stay inside physical VMEM (64 MiB/TC on v7x,
    128 MiB on v5e/v6e).
    """
    block_bytes = 4 * 1024 * 1024          # v5e / v6e: ~94% of HBM roofline
    vmem_limit = 40 * 1024 * 1024          # > v5e's 16 MiB scoped default
    try:
        info = pltpu.get_tpu_info()
        if int(info.vmem_capacity_bytes) <= 64 * 1024 * 1024:
            # v7x-class chip: faster HBM -> amortize the per-step overhead
            # with bigger blocks; 8 MiB blocks -> 32 MiB double-buffered.
            block_bytes = 8 * 1024 * 1024
            vmem_limit = 48 * 1024 * 1024  # < 64 MiB physical per TC
    except Exception:
        pass                                # interpret mode / unknown chip
    return block_bytes, vmem_limit


def _pallas_identity_copy_2d(x2d):
    """Copy a (rows, 128) lane-dense array through a tiled Pallas kernel."""
    rows, lanes = x2d.shape
    itemsize = jnp.dtype(x2d.dtype).itemsize
    block_bytes, vmem_limit = _chip_block_config()

    # Native packed sublane count: 8 for 32-bit, 16 for bf16/fp16, 32 for int8.
    min_sub = 8 * max(1, 4 // itemsize)
    tile_rows = (block_bytes // (lanes * itemsize)) // min_sub * min_sub
    tile_rows = max(min_sub, tile_rows)
    if tile_rows >= rows:
        # Single block covering the whole sublane dim (a full-extent block is
        # always a legal block shape regardless of (8,128) divisibility).
        tile_rows = rows

    grid = (pl.cdiv(rows, tile_rows),)      # ragged last block: OOB writes dropped
    bytes_accessed = 2 * rows * lanes * itemsize

    return pl.pallas_call(
        _copy_kernel,
        out_shape=jax.ShapeDtypeStruct((rows, lanes), x2d.dtype),
        grid=grid,
        in_specs=[pl.BlockSpec((tile_rows, lanes), lambda i: (i, 0))],
        out_specs=pl.BlockSpec((tile_rows, lanes), lambda i: (i, 0)),
        compiler_params=pltpu.CompilerParams(
            dimension_semantics=("parallel",),
            vmem_limit_bytes=vmem_limit,
        ),
        cost_estimate=pl.CostEstimate(
            flops=0, transcendentals=0, bytes_accessed=bytes_accessed),
    )(x2d)


def _resolve_shape(shape, total):
    """Resolve a possible -1 in the target shape (torch .view semantics)."""
    shape = list(shape)
    if shape.count(-1) > 1:
        raise ValueError("only one dimension can be inferred (-1)")
    if -1 in shape:
        known = 1
        for s in shape:
            if s != -1:
                known *= s
        if known == 0 or total % known != 0:
            raise ValueError(
                f"shape {tuple(shape)} is invalid for input of size {total}")
        shape[shape.index(-1)] = total // known
    out_total = 1
    for s in shape:
        out_total *= s
    if out_total != total:
        raise ValueError(
            f"shape {tuple(shape)} is invalid for input of size {total}")
    return tuple(shape)


def reshape_forward(x, shape, copy=True):
    """Equivalent of torch Reshape(shape).forward(x) = x.view(*shape).

    copy=False takes the metadata-only (zero-copy) path, which is the true
    optimum for a contiguous .view.  copy=True routes the data through the
    Pallas memcpy kernel.
    """
    total = x.size
    shape = _resolve_shape(shape, total)

    # Metadata-only paths: explicit zero-copy request, empty tensors, and
    # element counts that are not a lane multiple (avoids the old pad
    # fallback's extra HBM passes — reshape here is free anyway).
    if (not copy) or total == 0 or total % _LANE != 0:
        return jnp.reshape(x, shape)

    flat = x.reshape(-1)                      # metadata-only for contiguous arrays
    x2d = flat.reshape(total // _LANE, _LANE)  # lane-dense slab
    y2d = _pallas_identity_copy_2d(x2d)
    return y2d.reshape(shape)


if __name__ == "__main__":
    key = jax.random.PRNGKey(0)
    # NCHW input, as a DDPM conv stack would produce: (batch=2, C=4, H=16, W=16)
    x = jax.random.normal(key, (2, 4, 16, 16), dtype=jnp.float32)

    # Typical DDPM usage: flatten channel/spatial dims -> Reshape((-1, 4*16*16))
    target_shape = (-1, 4 * 16 * 16)

    # Kernel (copy) path.
    y = reshape_forward(x, target_shape, copy=True)
    y = jax.block_until_ready(y)

    # Reference: plain row-major reshape (== torch .view semantics).
    y_ref = x.reshape(2, 4 * 16 * 16)
    assert y.shape == y_ref.shape, (y.shape, y_ref.shape)
    assert y.dtype == x.dtype
    assert bool(jnp.all(y == y_ref))

    # Zero-copy path (true optimum) must also agree.
    y0 = jax.block_until_ready(reshape_forward(x, target_shape, copy=False))
    assert y0.shape == y_ref.shape
    assert bool(jnp.all(y0 == y_ref))

    print("KERNEL_OK")
</pallas_src>

<mosaic_0001>
module attributes {stable_mosaic.version = 11 : i64} {
  func.func @_copy_kernel(%arg0: i32, %arg1: memref<16x128xf32, #tpu.memory_space<vmem>>, %arg2: memref<16x128xf32, #tpu.memory_space<vmem>>) attributes {dimension_semantics = [#tpu.dimension_semantics<parallel>], iteration_bounds = array<i64: 1>, scalar_prefetch = 0 : i64, scratch_operands = 0 : i64, tpu.core_type = #tpu.core_type<tc>, window_params = [{transform_indices = @transform_0, window_bounds = array<i64: 16, 128>}, {transform_indices = @transform_1, window_bounds = array<i64: 16, 128>}]} {
    %c0 = arith.constant 0 : index
    %c0_0 = arith.constant 0 : index
    %0 = vector.load %arg1[%c0, %c0_0] : memref<16x128xf32, #tpu.memory_space<vmem>>, vector<16x128xf32>
    %c0_1 = arith.constant 0 : index
    %c0_2 = arith.constant 0 : index
    %1 = vector.load %arg2[%c0_1, %c0_2] : memref<16x128xf32, #tpu.memory_space<vmem>>, vector<16x128xf32>
    tpu.vector_store %arg2[%c0_1, %c0_2], %0 {strides = array<i32>} : memref<16x128xf32, #tpu.memory_space<vmem>>, vector<16x128xf32>,
    return
  }
  func.func @transform_0(%arg0: i32) -> (i32, i32) {
    %c0_i32 = arith.constant 0 : i32
    %c0_i32_0 = arith.constant 0 : i32
    return %arg0, %c0_i32 : i32, i32
  }
  func.func @transform_1(%arg0: i32) -> (i32, i32) {
    %c0_i32 = arith.constant 0 : i32
    %c0_i32_0 = arith.constant 0 : i32
    return %arg0, %c0_i32 : i32, i32
  }
}

</mosaic_0001>

<bundles_post_ra>
// kernel: tpu_custom_call.1
= control target key start
LH: loop header
LB: loop body
LE: loop exit
PB: predicated region body
PF: predicated region fallthrough
CT: control target
= control target key end

     0   :  { %6 = vsyncpa [#allocation3], 0  ;;  %s134_s0 = inlined_call_operand.hbm [shape: f32[16,128], index: 0, kind: input, shape index: {}]   ;;  %s135_s1 = inlined_call_operand.hbm [shape: f32[16,128], index: 1, kind: output, shape index: {}]  }
   0x1   :  { %7 = vsyncpa [#allocation4], 0  ;;  %s96_s6 = smov [#allocation2]   ;;  %s48_s10 = scalar_lea.hbm %s134_s0, 256 }
   0x2   :  { %s13_s7 = sshll.u32 %s96_s6, 4  ;;  %p49_p0 = scmp.ne.s32.totalorder %s134_s0, %s48_s10  ;;  %s14_s7 = int_to_ptr.vmem [resolvable:$true] %s13_s7 }
   0x3   :  { %p52_p1 = scmp.lt.u32.totalorder %s48_s10, %s134_s0 }
   0x5   :  { %p54_p2 = pnand %p52_p1, %p49_p0 }
   0x7   :  { %57 = shalt.err (!%p54_p2)
}
   0x8   :  { %s58_s15 = scalar_lea.vmem %s14_s7, 256  ;;  %p63_p4 = scmp.lt.s32.totalorder %s14_s7, %s14_s7 }
   0x9   :  { %p59_p3 = scmp.ne.s32.totalorder %s14_s7, %s58_s15  ;;  %p64_p5 = scmp.lt.s32.totalorder %s58_s15, %s58_s15 }
   0xb   :  { %p65_p6 = por %p64_p5, %p63_p4 }
   0xd   :  { %p66_p7 = pnand %p65_p6, %p59_p3 }
   0xf   :  { %69 = shalt.err (!%p66_p7)
}
  0x10   :  { %s97_s16 = smov 128   ;;  %s98_s17 = smov 8  }
  0x11   :  { %19 = dma.hbm_to_vmem [thread:$0]  %s134_s0, 256, %s14_s7, [#allocation3], %s97_s16, %s97_s16, %s98_s17  }
  0x12   :  { %92 = dma.done.wait [#allocation3], 256  }
  0x13   :  { %93 = vsyncadd [#allocation3], 4294967040  ;;  %s99_s20 = smov [#allocation5]   ;;  %v23_v0 = vld [vmem:[#allocation2] sm:$0xff]  ;;  %v24_v1 = vld [vmem:[#allocation2 + $0x8] sm:$0xff] }
  0x14   :  { %s32_s21 = sshll.u32 %s99_s20, 4  ;;  %25 = vst [vmem:[#allocation5] sm:$0xff] %v23_v0  ;;  %26 = vst [vmem:[#allocation5 + $0x8] sm:$0xff] %v24_v1  ;;  %s33_s21 = int_to_ptr.vmem [resolvable:$true] %s32_s21 }
  0x15   :  { %s70_s22 = scalar_lea.vmem %s33_s21, 256  ;;  %p75_p9 = scmp.lt.s32.totalorder %s33_s21, %s33_s21 }
  0x16   :  { %p71_p8 = scmp.ne.s32.totalorder %s33_s21, %s70_s22  ;;  %p76_p10 = scmp.lt.s32.totalorder %s70_s22, %s70_s22 }
  0x18   :  { %p77_p11 = por %p76_p10, %p75_p9 }
  0x1a   :  { %p78_p12 = pnand %p77_p11, %p71_p8 }
  0x1c   :  { %81 = shalt.err (!%p78_p12)
}
  0x1d   :  { %s82_s0 = scalar_lea.hbm %s135_s1, 256 }
  0x1e   :  { %p83_p13 = scmp.ne.s32.totalorder %s135_s1, %s82_s0  ;;  %p86_p0 = scmp.lt.u32.totalorder %s82_s0, %s135_s1 }
  0x20   :  { %p88_p1 = pnand %p86_p0, %p83_p13 }
  0x22   :  { %91 = shalt.err (!%p88_p1)
}
  0x23   :  { %38 = dma.vmem_to_hbm [thread:$0]  %s33_s21, 256, %s135_s1, [#allocation4], %s97_s16, %s97_s16, %s98_s17  }
  0x24   :  { %94 = dma.done.wait [#allocation4], 256  }
  0x25   :  { %95 = vsyncadd [#allocation4], 4294967040 }
  0x26   :  { %42 = vsyncpa [#allocation3], 1 }
  0x27   :  { %43 = vsyncpa [#allocation4], 1 }

</bundles_post_ra>
